<compile_context>
chip_gen: v6e
topology: v6e:2x2x1
jax: 0.10.0
libtpu: 0.0.40
codegen_flags: <defaults>
</compile_context>

<pallas_src>
import jax
import jax.numpy as jnp
from jax.experimental import pallas as pl
from jax.experimental.pallas import tpu as pltpu

_BN_EPS = 1e-5


def _classifier_kernel(ph1_ref, ph2_ref,
                       w1_ref, b1_ref, scale1_ref, shift1_ref,
                       w2_ref, b2_ref,
                       w3_ref, b3_ref,
                       pred_ref):
    tb = ph1_ref.shape[0]

    # Fused branch matmul: one w1 push for both ph1 and ph2 tiles.
    x = jnp.concatenate([ph1_ref[...], ph2_ref[...]], axis=0)        # (2*TB, F)
    h = jnp.dot(x, w1_ref[...], preferred_element_type=jnp.float32) + b1_ref[...]
    h = jnp.maximum(h, 0.0)                                          # relu
    h = h * scale1_ref[...] + shift1_ref[...]                        # bn1 (eval, folded)

    out = h[:tb] * h[tb:]                                            # elementwise gate

    res = jnp.dot(out, w2_ref[...], preferred_element_type=jnp.float32) + b2_ref[...]
    res = jnp.maximum(res, 0.0)                                      # relu
    # dropout: eval mode -> identity

    # Final 1-wide projection done with the batch on lanes -> lane-dense store.
    # w3_ref is [1, H2]; contract over H2 against res's H2 (trans_b) -> (1, TB).
    logit = jax.lax.dot_general(
        w3_ref[...], res,
        dimension_numbers=(((1,), (1,)), ((), ())),
        preferred_element_type=jnp.float32) + b3_ref[...]            # (1, TB)
    pred_ref[...] = jax.nn.sigmoid(logit)                            # (1, TB)


def classifier_forward(ph1, ph2, params, y=None, *, tb=None):
    B, F = ph1.shape
    if tb is None:
        # Large tiles amortize per-grid-step overhead; inputs here are narrow so
        # even TB=512 is only ~2*2*512*F*4 B of double-buffered VMEM.
        tb = 128 if B <= 512 else 512
    num_tiles = pl.cdiv(B, tb)
    b_pad = num_tiles * tb
    if b_pad != B:
        pad = ((0, b_pad - B), (0, 0))
        ph1 = jnp.pad(ph1, pad)
        ph2 = jnp.pad(ph2, pad)

    # Fold eval-mode BatchNorm1d into a single affine (done once, outside grid).
    scale1 = params["bn1_gamma"] * jax.lax.rsqrt(params["bn1_var"] + _BN_EPS)
    shift1 = params["bn1_beta"] - params["bn1_mean"] * scale1
    w3_row = params["w3"].reshape(1, -1)                             # [1, H2]

    operands = (
        ph1, ph2,
        params["w1"], params["b1"], scale1, shift1,
        params["w2"], params["b2"],
        w3_row, params["b3"],
    )

    def const(shape):
        return pl.BlockSpec(shape, lambda i: (0,) * len(shape))

    pred2d = pl.pallas_call(
        _classifier_kernel,
        out_shape=jax.ShapeDtypeStruct((num_tiles, tb), jnp.float32),
        grid=(num_tiles,),
        in_specs=[
            pl.BlockSpec((tb, F), lambda i: (i, 0)),     # ph1 tile
            pl.BlockSpec((tb, F), lambda i: (i, 0)),     # ph2 tile
            const(params["w1"].shape),
            const(params["b1"].shape),
            const(scale1.shape),
            const(shift1.shape),
            const(params["w2"].shape),
            const(params["b2"].shape),
            const(w3_row.shape),
            const(params["b3"].shape),
        ],
        out_specs=pl.BlockSpec((1, tb), lambda i: (i, 0)),
        compiler_params=pltpu.CompilerParams(
            dimension_semantics=("parallel",)),
    )(*operands)

    pred = pred2d.reshape(-1)[:B]                        # torch .squeeze()
    result = {"pred": pred}
    if y is not None:
        # Small glue-level reductions (BCELoss / accuracy) outside the kernel.
        p = jnp.clip(pred, 1e-12, 1.0 - 1e-12)
        loss = -jnp.mean(y * jnp.log(p) + (1.0 - y) * jnp.log1p(-p))
        correct = jnp.sum((jnp.round(pred) == y).astype(jnp.float32))
        result["loss"] = loss
        result["acc"] = correct / y.shape[0]
        result["correct"] = correct
    return result


def init_params(key, n_features, n_hidden1, n_hidden2):
    """Deterministic init mirroring torch.nn.Linear / BatchNorm1d shapes."""
    ks = jax.random.split(key, 10)

    def linear(kw, kb, fan_in, fan_out):
        bound = 1.0 / jnp.sqrt(fan_in)
        w = jax.random.uniform(kw, (fan_in, fan_out), jnp.float32, -bound, bound)
        b = jax.random.uniform(kb, (1, fan_out), jnp.float32, -bound, bound)
        return w, b

    w1, b1 = linear(ks[0], ks[1], n_features, n_hidden1)
    w2, b2 = linear(ks[2], ks[3], n_hidden1, n_hidden2)
    w3, b3 = linear(ks[4], ks[5], n_hidden2, 1)
    bn1_gamma = jax.random.uniform(ks[6], (1, n_hidden1), jnp.float32, 0.5, 1.5)
    bn1_beta = 0.1 * jax.random.normal(ks[7], (1, n_hidden1), jnp.float32)
    bn1_mean = 0.1 * jax.random.normal(ks[8], (1, n_hidden1), jnp.float32)
    bn1_var = jax.random.uniform(ks[9], (1, n_hidden1), jnp.float32, 0.5, 1.5)
    return {
        "w1": w1, "b1": b1,
        "w2": w2, "b2": b2,
        "w3": w3, "b3": b3,
        "bn1_gamma": bn1_gamma, "bn1_beta": bn1_beta,
        "bn1_mean": bn1_mean, "bn1_var": bn1_var,
    }


if __name__ == "__main__":
    B, n_features, n_hidden1, n_hidden2 = 8, 32, 32, 16

    key = jax.random.PRNGKey(0)
    k_ph1, k_ph2, k_y, k_params = jax.random.split(key, 4)

    ph1 = jax.random.normal(k_ph1, (B, n_features), jnp.float32)
    ph2 = jax.random.normal(k_ph2, (B, n_features), jnp.float32)
    y = jax.random.bernoulli(k_y, 0.5, (B,)).astype(jnp.float32)

    params = init_params(k_params, n_features, n_hidden1, n_hidden2)

    out = classifier_forward(ph1, ph2, params, y=y)
    jax.block_until_ready(out)

    assert out["pred"].shape == (B,)
    assert bool(jnp.all((out["pred"] >= 0.0) & (out["pred"] <= 1.0)))
    assert bool(jnp.isfinite(out["loss"]))
    print("KERNEL_OK")
</pallas_src>

<mosaic_0001>
module attributes {stable_mosaic.version = 11 : i64} {
  func.func @_classifier_kernel(%arg0: i32, %arg1: memref<128x32xf32, #tpu.memory_space<vmem>>, %arg2: memref<128x32xf32, #tpu.memory_space<vmem>>, %arg3: memref<32x32xf32, #tpu.memory_space<vmem>>, %arg4: memref<1x32xf32, #tpu.memory_space<vmem>>, %arg5: memref<1x32xf32, #tpu.memory_space<vmem>>, %arg6: memref<1x32xf32, #tpu.memory_space<vmem>>, %arg7: memref<32x16xf32, #tpu.memory_space<vmem>>, %arg8: memref<1x16xf32, #tpu.memory_space<vmem>>, %arg9: memref<1x16xf32, #tpu.memory_space<vmem>>, %arg10: memref<1x1xf32, #tpu.memory_space<vmem>>, %arg11: memref<1x128xf32, #tpu.memory_space<vmem>>) attributes {dimension_semantics = [#tpu.dimension_semantics<parallel>], iteration_bounds = array<i64: 1>, scalar_prefetch = 0 : i64, scratch_operands = 0 : i64, tpu.core_type = #tpu.core_type<tc>, window_params = [{transform_indices = @transform_0, window_bounds = array<i64: 128, 32>}, {transform_indices = @transform_1, window_bounds = array<i64: 128, 32>}, {pipeline_mode = #tpu.pipeline_mode<synchronous>, transform_indices = @transform_2, window_bounds = array<i64: 32, 32>}, {pipeline_mode = #tpu.pipeline_mode<synchronous>, transform_indices = @transform_3, window_bounds = array<i64: 1, 32>}, {pipeline_mode = #tpu.pipeline_mode<synchronous>, transform_indices = @transform_4, window_bounds = array<i64: 1, 32>}, {pipeline_mode = #tpu.pipeline_mode<synchronous>, transform_indices = @transform_5, window_bounds = array<i64: 1, 32>}, {pipeline_mode = #tpu.pipeline_mode<synchronous>, transform_indices = @transform_6, window_bounds = array<i64: 32, 16>}, {pipeline_mode = #tpu.pipeline_mode<synchronous>, transform_indices = @transform_7, window_bounds = array<i64: 1, 16>}, {pipeline_mode = #tpu.pipeline_mode<synchronous>, transform_indices = @transform_8, window_bounds = array<i64: 1, 16>}, {pipeline_mode = #tpu.pipeline_mode<synchronous>, transform_indices = @transform_9, window_bounds = array<i64: 1, 1>}, {transform_indices = @transform_10, window_bounds = array<i64: 1, 128>}]} {
    %c0 = arith.constant 0 : index
    %c0_0 = arith.constant 0 : index
    %0 = vector.load %arg1[%c0, %c0_0] : memref<128x32xf32, #tpu.memory_space<vmem>>, vector<128x32xf32>
    %c0_1 = arith.constant 0 : index
    %c0_2 = arith.constant 0 : index
    %1 = vector.load %arg2[%c0_1, %c0_2] : memref<128x32xf32, #tpu.memory_space<vmem>>, vector<128x32xf32>
    %2 = tpu.concatenate %0, %1 in 0 : vector<128x32xf32>, vector<128x32xf32> -> vector<256x32xf32>
    %c0_3 = arith.constant 0 : index
    %c0_4 = arith.constant 0 : index
    %3 = vector.load %arg3[%c0_3, %c0_4] : memref<32x32xf32, #tpu.memory_space<vmem>>, vector<32x32xf32>
    %cst = arith.constant dense<0.000000e+00> : vector<256x32xf32>
    %4 = tpu.matmul %2, %3, %cst {dimension_numbers = #tpu.dot_dimension_numbers<[1], [0], [0], [1], [0, 0, 1, 1], [], []>} : vector<256x32xf32>, vector<32x32xf32>, vector<256x32xf32> -> vector<256x32xf32>
    %c0_5 = arith.constant 0 : index
    %c0_6 = arith.constant 0 : index
    %5 = vector.load %arg4[%c0_5, %c0_6] : memref<1x32xf32, #tpu.memory_space<vmem>>, vector<1x32xf32>
    %6 = vector.broadcast %5 : vector<1x32xf32> to vector<256x32xf32>
    %7 = arith.addf %4, %6 : vector<256x32xf32>
    %cst_7 = arith.constant 0.000000e+00 : f32
    %8 = vector.broadcast %cst_7 : f32 to vector<256x32xf32>
    %9 = arith.maximumf %7, %8 : vector<256x32xf32>
    %c0_8 = arith.constant 0 : index
    %c0_9 = arith.constant 0 : index
    %10 = vector.load %arg5[%c0_8, %c0_9] : memref<1x32xf32, #tpu.memory_space<vmem>>, vector<1x32xf32>
    %11 = vector.broadcast %10 : vector<1x32xf32> to vector<256x32xf32>
    %12 = arith.mulf %9, %11 : vector<256x32xf32>
    %c0_10 = arith.constant 0 : index
    %c0_11 = arith.constant 0 : index
    %13 = vector.load %arg6[%c0_10, %c0_11] : memref<1x32xf32, #tpu.memory_space<vmem>>, vector<1x32xf32>
    %14 = vector.broadcast %13 : vector<1x32xf32> to vector<256x32xf32>
    %15 = arith.addf %12, %14 : vector<256x32xf32>
    %16 = vector.extract_strided_slice %15 {offsets = [0, 0], sizes = [128, 32], strides = [1, 1]} : vector<256x32xf32> to vector<128x32xf32>
    %17 = vector.extract_strided_slice %15 {offsets = [128, 0], sizes = [128, 32], strides = [1, 1]} : vector<256x32xf32> to vector<128x32xf32>
    %18 = arith.mulf %16, %17 : vector<128x32xf32>
    %c0_12 = arith.constant 0 : index
    %c0_13 = arith.constant 0 : index
    %19 = vector.load %arg7[%c0_12, %c0_13] : memref<32x16xf32, #tpu.memory_space<vmem>>, vector<32x16xf32>
    %cst_14 = arith.constant dense<0.000000e+00> : vector<128x16xf32>
    %20 = tpu.matmul %18, %19, %cst_14 {dimension_numbers = #tpu.dot_dimension_numbers<[1], [0], [0], [1], [0, 0, 1, 1], [], []>} : vector<128x32xf32>, vector<32x16xf32>, vector<128x16xf32> -> vector<128x16xf32>
    %c0_15 = arith.constant 0 : index
    %c0_16 = arith.constant 0 : index
    %21 = vector.load %arg8[%c0_15, %c0_16] : memref<1x16xf32, #tpu.memory_space<vmem>>, vector<1x16xf32>
    %22 = vector.broadcast %21 : vector<1x16xf32> to vector<128x16xf32>
    %23 = arith.addf %20, %22 : vector<128x16xf32>
    %cst_17 = arith.constant 0.000000e+00 : f32
    %24 = vector.broadcast %cst_17 : f32 to vector<128x16xf32>
    %25 = arith.maximumf %23, %24 : vector<128x16xf32>
    %c0_18 = arith.constant 0 : index
    %c0_19 = arith.constant 0 : index
    %26 = vector.load %arg9[%c0_18, %c0_19] : memref<1x16xf32, #tpu.memory_space<vmem>>, vector<1x16xf32>
    %cst_20 = arith.constant dense<0.000000e+00> : vector<1x128xf32>
    %27 = tpu.matmul %26, %25, %cst_20 {dimension_numbers = #tpu.dot_dimension_numbers<[1], [1], [0], [0], [0, 0, 1, 0], [], []>} : vector<1x16xf32>, vector<128x16xf32>, vector<1x128xf32> -> vector<1x128xf32>
    %c0_21 = arith.constant 0 : index
    %c0_22 = arith.constant 0 : index
    %28 = vector.load %arg10[%c0_21, %c0_22] : memref<1x1xf32, #tpu.memory_space<vmem>>, vector<1x1xf32>
    %29 = vector.broadcast %28 : vector<1x1xf32> to vector<1x128xf32>
    %30 = arith.addf %27, %29 : vector<1x128xf32>
    %31 = arith.negf %30 : vector<1x128xf32>
    %32 = math.exp %31 : vector<1x128xf32>
    %cst_23 = arith.constant 1.000000e+00 : f32
    %33 = vector.broadcast %cst_23 : f32 to vector<1x128xf32>
    %34 = arith.addf %33, %32 : vector<1x128xf32>
    %35 = arith.divf %33, %34 : vector<1x128xf32>
    %c0_24 = arith.constant 0 : index
    %c0_25 = arith.constant 0 : index
    %36 = vector.load %arg11[%c0_24, %c0_25] : memref<1x128xf32, #tpu.memory_space<vmem>>, vector<1x128xf32>
    tpu.vector_store %arg11[%c0_24, %c0_25], %35 {strides = array<i32>} : memref<1x128xf32, #tpu.memory_space<vmem>>, vector<1x128xf32>,
    return
  }
  func.func @transform_0(%arg0: i32) -> (i32, i32) {
    %c0_i32 = arith.constant 0 : i32
    %c0_i32_0 = arith.constant 0 : i32
    return %arg0, %c0_i32 : i32, i32
  }
  func.func @transform_1(%arg0: i32) -> (i32, i32) {
    %c0_i32 = arith.constant 0 : i32
    %c0_i32_0 = arith.constant 0 : i32
    return %arg0, %c0_i32 : i32, i32
  }
  func.func @transform_2(%arg0: i32) -> (i32, i32) {
    %c0_i32 = arith.constant 0 : i32
    %c0_i32_0 = arith.constant 0 : i32
    %c0_i32_1 = arith.constant 0 : i32
    return %c0_i32, %c0_i32_0 : i32, i32
  }
  func.func @transform_3(%arg0: i32) -> (i32, i32) {
    %c0_i32 = arith.constant 0 : i32
    %c0_i32_0 = arith.constant 0 : i32
    %c0_i32_1 = arith.constant 0 : i32
    return %c0_i32, %c0_i32_0 : i32, i32
  }
  func.func @transform_4(%arg0: i32) -> (i32, i32) {
    %c0_i32 = arith.constant 0 : i32
    %c0_i32_0 = arith.constant 0 : i32
    %c0_i32_1 = arith.constant 0 : i32
    return %c0_i32, %c0_i32_0 : i32, i32
  }
  func.func @transform_5(%arg0: i32) -> (i32, i32) {
    %c0_i32 = arith.constant 0 : i32
    %c0_i32_0 = arith.constant 0 : i32
    %c0_i32_1 = arith.constant 0 : i32
    return %c0_i32, %c0_i32_0 : i32, i32
  }
  func.func @transform_6(%arg0: i32) -> (i32, i32) {
    %c0_i32 = arith.constant 0 : i32
    %c0_i32_0 = arith.constant 0 : i32
    %c0_i32_1 = arith.constant 0 : i32
    return %c0_i32, %c0_i32_0 : i32, i32
  }
  func.func @transform_7(%arg0: i32) -> (i32, i32) {
    %c0_i32 = arith.constant 0 : i32
    %c0_i32_0 = arith.constant 0 : i32
    %c0_i32_1 = arith.constant 0 : i32
    return %c0_i32, %c0_i32_0 : i32, i32
  }
  func.func @transform_8(%arg0: i32) -> (i32, i32) {
    %c0_i32 = arith.constant 0 : i32
    %c0_i32_0 = arith.constant 0 : i32
    %c0_i32_1 = arith.constant 0 : i32
    return %c0_i32, %c0_i32_0 : i32, i32
  }
  func.func @transform_9(%arg0: i32) -> (i32, i32) {
    %c0_i32 = arith.constant 0 : i32
    %c0_i32_0 = arith.constant 0 : i32
    %c0_i32_1 = arith.constant 0 : i32
    return %c0_i32, %c0_i32_0 : i32, i32
  }
  func.func @transform_10(%arg0: i32) -> (i32, i32) {
    %c0_i32 = arith.constant 0 : i32
    %c0_i32_0 = arith.constant 0 : i32
    return %arg0, %c0_i32 : i32, i32
  }
}

</mosaic_0001>

<bundles_post_ra>
// kernel: tpu_custom_call.1
= control target key start
LH: loop header
LB: loop body
LE: loop exit
PB: predicated region body
PF: predicated region fallthrough
CT: control target
= control target key end

     0   :  { %s1611_s0 = inlined_call_operand.vmem [shape: f32[128,32], index: 0, kind: input, shape index: {}]   ;;  %s1612_s1 = inlined_call_operand.vmem [shape: f32[128,32], index: 1, kind: input, shape index: {}]   ;;  %s1613_s2 = inlined_call_operand.vmem [shape: f32[32,32], index: 2, kind: input, shape index: {}]   ;;  %s1614_s3 = inlined_call_operand.vmem [shape: f32[1,32], index: 3, kind: input, shape index: {}]   ;;  %s1615_s4 = inlined_call_operand.vmem [shape: f32[1,32], index: 4, kind: input, shape index: {}]   ;;  %s1616_s5 = inlined_call_operand.vmem [shape: f32[1,32], index: 5, kind: input, shape index: {}]   ;;  %s1617_s6 = inlined_call_operand.vmem [shape: f32[32,16], index: 6, kind: input, shape index: {}]   ;;  %s1618_s7 = inlined_call_operand.vmem [shape: f32[1,16], index: 7, kind: input, shape index: {}]   ;;  %s1619_s8 = inlined_call_operand.vmem [shape: f32[1,16], index: 8, kind: input, shape index: {}]   ;;  %s1620_s9 = inlined_call_operand.<no memory space> [shape: f32[1,1], index: 9, kind: input, shape index: {}]   ;;  %s1621_s10 = inlined_call_operand.hbm [shape: f32[1,128], index: 10, kind: output, shape index: {}]  }
   0x1   :  { %v15_v0 = vstv %s1620_s9 }
   0x2   :  { %16 = vst [vmem:[#allocation2] sm:$0x1] %v15_v0 }
   0x3   :  { %v73_v1 = vld [vmem:[%s1613_s2 + $0x18] sm:$0xff]  ;;  %v72_v2 = vld [vmem:[%s1613_s2 + $0x10] sm:$0xff]  ;;  %vm81_vm0 = vcmask 261120   ;;  %v38_v3 = vld [vmem:[%s1611_s0] sm:$0xff] }
   0x4   :  { %1046 = vmatprep.subr.mxu0 %v73_v1  ;;  %v71_v4 = vld [vmem:[%s1613_s2 + $0x8] sm:$0xff]  ;;  %1054 = vmatprep.mubr.msk.f32.mxu0 %vm81_vm0, %v38_v3  ;;  %v70_v5 = vld [vmem:[%s1613_s2] sm:$0xff]  ;;  %v40_v7 = vld [vmem:[%s1611_s0 + $0x10] sm:$0xff] }
   0x5   :  { %1047 = vmatpush3.msra.mxu0 %v73_v1  ;;  %v39_v6 = vld [vmem:[%s1611_s0 + $0x8] sm:$0xff]  ;;  %v41_v8 = vld [vmem:[%s1611_s0 + $0x18] sm:$0xff]  ;;  %v42_v9 = vld [vmem:[%s1611_s0 + $0x20] sm:$0xff] }
   0x6   :  { %1048 = vmatprep.subr.mxu0 %v72_v2 }
   0x7   :  { %1049 = vmatpush3.msra.mxu0 %v72_v2 }
   0x8   :  { %1050 = vmatprep.subr.mxu0 %v71_v4 }
   0x9   :  { %1051 = vmatpush3.msra.mxu0 %v71_v4 }
   0xa   :  { %1052 = vmatprep.subr.mxu0 %v70_v5 }
   0xb   :  { %1053 = vmatpush3.msra.mxu0 %v70_v5 }
   0xc   :  { %1055 = vmatmul.mubr.msk.f32.vlgmr.msra.gmra.mxu0 %vm81_vm0, %v39_v6 }
   0xd   :  { %1057 = vmatprep.mubr.msk.f32.mxu0 %vm81_vm0, %v40_v7 }
   0xe   :  { %17 = vsyncpa [#allocation4], 0  ;;  %v43_v10 = vld [vmem:[%s1611_s0 + $0x28] sm:$0xff]  ;;  %v44_v11 = vld [vmem:[%s1611_s0 + $0x30] sm:$0xff]  ;;  %vm1201_vm1 = vmmov 0   ;;  %vm760_vm2 = vcmask 130048  }
   0xf   :  { %v45_v12 = vld [vmem:[%s1611_s0 + $0x38] sm:$0xff]  ;;  %v46_v13 = vld [vmem:[%s1611_s0 + $0x40] sm:$0xff]  ;;  %v47_v14 = vld [vmem:[%s1611_s0 + $0x48] sm:$0xff]  ;;  %s1203_s2 = smov [#allocation3]  }
  0x10   :  { %1058 = vmatmul.mubr.msk.f32.gmra.mxu0 %vm81_vm0, %v41_v8  ;;  %v48_v15 = vld [vmem:[%s1611_s0 + $0x50] sm:$0xff]  ;;  %v49_v16 = vld [vmem:[%s1611_s0 + $0x58] sm:$0xff]  ;;  %v50_v17 = vld [vmem:[%s1611_s0 + $0x60] sm:$0xff]  ;;  %s895_s30 = sshll.u32 %s1203_s2, 4  ;;  %s896_s30 = int_to_ptr.vmem [resolvable:$true] %s895_s30 }
  0x11   :  { %1060 = vmatprep.mubr.msk.f32.mxu0 %vm81_vm0, %v42_v9  ;;  %v51_v18 = vld [vmem:[%s1611_s0 + $0x68] sm:$0xff]  ;;  %v52_v19 = vld [vmem:[%s1611_s0 + $0x70] sm:$0xff]  ;;  %v53_v20 = vld [vmem:[%s1611_s0 + $0x78] sm:$0xff]  ;;  %s1182_s11 = scalar_lea.vmem %s896_s30, 32  ;;  %p1183_p1 = scmp.lt.s32.totalorder %s896_s30, %s896_s30 }
  0x12   :  { %v54_v21 = vld [vmem:[%s1612_s1] sm:$0xff]  ;;  %v55_v22 = vld [vmem:[%s1612_s1 + $0x8] sm:$0xff]  ;;  %v56_v23 = vld [vmem:[%s1612_s1 + $0x10] sm:$0xff] }
  0x13   :  { %v57_v24 = vld [vmem:[%s1612_s1 + $0x18] sm:$0xff]  ;;  %v58_v25 = vld [vmem:[%s1612_s1 + $0x20] sm:$0xff]  ;;  %v59_v26 = vld [vmem:[%s1612_s1 + $0x28] sm:$0xff] }
  0x14   :  { %1061 = vmatmul.mubr.msk.f32.gmra.mxu0 %vm81_vm0, %v43_v10  ;;  %v60_v27 = vld [vmem:[%s1612_s1 + $0x30] sm:$0xff]  ;;  %v61_v28 = vld [vmem:[%s1612_s1 + $0x38] sm:$0xff]  ;;  %v62_v29 = vld [vmem:[%s1612_s1 + $0x40] sm:$0xff] }
  0x15   :  { %1063 = vmatprep.mubr.msk.f32.mxu0 %vm81_vm0, %v44_v11  ;;  %v63_v30 = vld [vmem:[%s1612_s1 + $0x48] sm:$0xff]  ;;  %v64_v31 = vld [vmem:[%s1612_s1 + $0x50] sm:$0xff]  ;;  %v65_v32 = vld [vmem:[%s1612_s1 + $0x58] sm:$0xff] }
  0x16   :  { %v66_v33 = vld [vmem:[%s1612_s1 + $0x60] sm:$0xff]  ;;  %v67_v34 = vld [vmem:[%s1612_s1 + $0x68] sm:$0xff]  ;;  %v68_v35 = vld [vmem:[%s1612_s1 + $0x70] sm:$0xff] }
  0x17   :  { %v69_v36 = vld [vmem:[%s1612_s1 + $0x78] sm:$0xff]  ;;  %v531_v38 = vld [vmem:[%s1617_s6 + $0x10] sm:$0xff]  ;;  %v530_v39 = vld [vmem:[%s1617_s6 + $0x8] sm:$0xff] }
  0x18   :  { %1064 = vmatmul.mubr.msk.f32.gmra.mxu0 %vm81_vm0, %v45_v12  ;;  %v532_v37 = vld [vmem:[%s1617_s6 + $0x18] sm:$0xff]  ;;  %v529_v40 = vld [vmem:[%s1617_s6] sm:$0xff] }
  0x19   :  { %1066 = vmatprep.mubr.msk.f32.mxu0 %vm81_vm0, %v46_v13  ;;  %1102 = vmatprep.subr.mxu1 %v532_v37  ;;  %v1421_v53 = vld [vmem:[%s1614_s3] ss:$0 sm:$0xff] }
  0x1a   :  { %1103 = vmatpush3.msra.mxu1 %v532_v37  ;;  %v1438_v0 = vld [vmem:[%s1615_s4] ss:$0 sm:$0xff] }
  0x1b   :  { %1104 = vmatprep.subr.mxu1 %v531_v38  ;;  %v1448_v10 = vld [vmem:[%s1616_s5] ss:$0 sm:$0xff] }
  0x1c   :  { %1067 = vmatmul.mubr.msk.f32.gmra.mxu0 %vm81_vm0, %v47_v14  ;;  %1105 = vmatpush3.msra.mxu1 %v531_v38 }
  0x1d   :  { %1069 = vmatprep.mubr.msk.f32.mxu0 %vm81_vm0, %v48_v15  ;;  %1106 = vmatprep.subr.mxu1 %v530_v39 }
  0x1e   :  { %1107 = vmatpush3.msra.mxu1 %v530_v39 }
  0x1f   :  { %1108 = vmatprep.subr.mxu1 %v529_v40 }
  0x20   :  { %1070 = vmatmul.mubr.msk.f32.gmra.mxu0 %vm81_vm0, %v49_v16  ;;  %1109 = vmatpush3.msra.mxu1 %v529_v40 }
  0x21   :  { %1072 = vmatprep.mubr.msk.f32.mxu0 %vm81_vm0, %v50_v17 }
  0x24   :  { %1073 = vmatmul.mubr.msk.f32.gmra.mxu0 %vm81_vm0, %v51_v18 }
  0x25   :  { %1075 = vmatprep.mubr.msk.f32.mxu0 %vm81_vm0, %v52_v19 }
  0x28   :  { %1076 = vmatmul.mubr.msk.f32.gmra.mxu0 %vm81_vm0, %v53_v20 }
  0x29   :  { %1078 = vmatprep.mubr.msk.f32.mxu0 %vm81_vm0, %v54_v21 }
  0x2c   :  { %1079 = vmatmul.mubr.msk.f32.gmra.mxu0 %vm81_vm0, %v55_v22 }
  0x2d   :  { %1081 = vmatprep.mubr.msk.f32.mxu0 %vm81_vm0, %v56_v23 }
  0x30   :  { %1082 = vmatmul.mubr.msk.f32.gmra.mxu0 %vm81_vm0, %v57_v24 }
  0x31   :  { %1084 = vmatprep.mubr.msk.f32.mxu0 %vm81_vm0, %v58_v25 }
  0x34   :  { %1085 = vmatmul.mubr.msk.f32.gmra.mxu0 %vm81_vm0, %v59_v26 }
  0x35   :  { %1087 = vmatprep.mubr.msk.f32.mxu0 %vm81_vm0, %v60_v27 }
  0x38   :  { %1088 = vmatmul.mubr.msk.f32.gmra.mxu0 %vm81_vm0, %v61_v28 }
  0x39   :  { %1090 = vmatprep.mubr.msk.f32.mxu0 %vm81_vm0, %v62_v29 }
  0x3c   :  { %1091 = vmatmul.mubr.msk.f32.gmra.mxu0 %vm81_vm0, %v63_v30 }
  0x3d   :  { %1093 = vmatprep.mubr.msk.f32.mxu0 %vm81_vm0, %v64_v31 }
  0x40   :  { %1094 = vmatmul.mubr.msk.f32.gmra.mxu0 %vm81_vm0, %v65_v32 }
  0x41   :  { %1096 = vmatprep.mubr.msk.f32.mxu0 %vm81_vm0, %v66_v33 }
  0x44   :  { %1097 = vmatmul.mubr.msk.f32.gmra.mxu0 %vm81_vm0, %v67_v34 }
  0x45   :  { %1099 = vmatprep.mubr.msk.f32.mxu0 %vm81_vm0, %v68_v35 }
  0x48   :  { %1100 = vmatmul.mubr.msk.f32.gmra.mxu0 %vm81_vm0, %v69_v36 }
  0xcc   :  { %v1056_v41 = vpop.f32.mrf.mxu0 }
  0xcd   :  { %v250_v55 = vadd.f32 %v1056_v41, %v1421_v53 }
  0xce   :  { %v244_v42 = vpop.f32.mrf.mxu0 }
  0xcf   :  { %v245_v56 = vadd.f32 %v1421_v53, %v244_v42  ;;  %v404_v61 = vmax.f32 %v250_v55, 0.0 }
  0xd0   :  { %v1059_v43 = vpop.f32.mrf.mxu0 }
  0xd1   :  { %v260_v58 = vadd.f32 %v1059_v43, %v1421_v53  ;;  %v403_v62 = vmax.f32 %v245_v56, 0.0  ;;  %v443_v5 = vmul.f32 %v1438_v0, %v404_v61 }
  0xd2   :  { %v254_v44 = vpop.f32.mrf.mxu0 }
  0xd3   :  { %v255_v60 = vadd.f32 %v1421_v53, %v254_v44  ;;  %v406_v1 = vmax.f32 %v260_v58, 0.0  ;;  %v442_v6 = vmul.f32 %v1438_v0, %v403_v62  ;;  %v482_v20 = vadd.f32 %v1448_v10, %v443_v5 }
  0xd4   :  { %v1062_v45 = vpop.f32.mrf.mxu0 }
  0xd5   :  { %v405_v3 = vmax.f32 %v255_v60, 0.0  ;;  %v270_v7 = vadd.f32 %v1062_v45, %v1421_v53  ;;  %v445_v14 = vmul.f32 %v1438_v0, %v406_v1  ;;  %v481_v24 = vadd.f32 %v1448_v10, %v442_v6 }
  0xd6   :  { %v264_v46 = vpop.f32.mrf.mxu0 }
  0xd7   :  { %v265_v8 = vadd.f32 %v1421_v53, %v264_v46  ;;  %v444_v16 = vmul.f32 %v1438_v0, %v405_v3  ;;  %v408_v21 = vmax.f32 %v270_v7, 0.0  ;;  %v484_v29 = vadd.f32 %v1448_v10, %v445_v14 }
  0xd8   :  { %v1065_v47 = vpop.f32.mrf.mxu0 }
  0xd9   :  { %v280_v11 = vadd.f32 %v1065_v47, %v1421_v53  ;;  %v407_v22 = vmax.f32 %v265_v8, 0.0  ;;  %v483_v34 = vadd.f32 %v1448_v10, %v444_v16  ;;  %v447_v38 = vmul.f32 %v1438_v0, %v408_v21 }
  0xda   :  { %v274_v48 = vpop.f32.mrf.mxu0 }
  0xdb   :  { %v410_v25 = vmax.f32 %v280_v11, 0.0  ;;  %v275_v30 = vadd.f32 %v1421_v53, %v274_v48  ;;  %v446_v39 = vmul.f32 %v1438_v0, %v407_v22  ;;  %v486_v62 = vadd.f32 %v1448_v10, %v447_v38 }
  0xdc   :  { %v1068_v49 = vpop.f32.mrf.mxu0 }
  0xdd   :  { %v290_v31 = vadd.f32 %v1068_v49, %v1421_v53  ;;  %v449_v43 = vmul.f32 %v1438_v0, %v410_v25  ;;  %v409_v47 = vmax.f32 %v275_v30, 0.0  ;;  %v485_v1 = vadd.f32 %v1448_v10, %v446_v39 }
  0xde   :  { %v284_v50 = vpop.f32.mrf.mxu0 }
  0xdf   :  { %v285_v40 = vadd.f32 %v1421_v53, %v284_v50  ;;  %v412_v48 = vmax.f32 %v290_v31, 0.0  ;;  %v488_v5 = vadd.f32 %v1448_v10, %v449_v43 }
  0xe0   :  { %v1414_v51 = vpop.f32.mrf.mxu0 }
  0xe1   :  { %v451_v11 = vmul.f32 %v1438_v0, %v412_v48 }
  0xe2   :  { %v1416_v52 = vpop.f32.mrf.mxu0 }
  0xe3   :  { %v295_v21 = vadd.f32 %v1421_v53, %v1416_v52 }
  0xe4   :  { %v1423_v54 = vpop.f32.mrf.mxu0 }
  0xe6   :  { %v1427_v57 = vpop.f32.mrf.mxu0 }
  0xe8   :  { %v1430_v59 = vpop.f32.mrf.mxu0 }
  0xea   :  { %v1433_v63 = vpop.f32.mrf.mxu0 }
  0xec   :  { %v1080_v2 = vpop.f32.mrf.mxu0 }
  0xed   :  { %v330_v4 = vadd.f32 %v1080_v2, %v1421_v53  ;;  %v411_v2 = vmax.f32 %v285_v40, 0.0 }
  0xee   :  { %v324_v9 = vpop.f32.mrf.mxu0 }
  0xef   :  { %v420_v12 = vmax.f32 %v330_v4, 0.0  ;;  %v325_v13 = vadd.f32 %v1421_v53, %v324_v9  ;;  %v448_v9 = vmul.f32 %v1438_v0, %v409_v47 }
  0xf0   :  { %v1083_v15 = vpop.f32.mrf.mxu0 }
  0xf1   :  { %v459_v17 = vmul.f32 %v1438_v0, %v420_v12  ;;  %v419_v18 = vmax.f32 %v325_v13, 0.0  ;;  %v340_v19 = vadd.f32 %v1083_v15, %v1421_v53 }
  0xf2   :  { %v334_v23 = vpop.f32.mrf.mxu0 }
  0xf3   :  { %v458_v26 = vmul.f32 %v1438_v0, %v419_v18  ;;  %v422_v27 = vmax.f32 %v340_v19, 0.0  ;;  %v335_v28 = vadd.f32 %v1421_v53, %v334_v23  ;;  %v498_v32 = vadd.f32 %v1448_v10, %v459_v17 }
  0xf4   :  { %v1086_v33 = vpop.f32.mrf.mxu0  ;;  %v450_v19 = vmul.f32 %v1438_v0, %v411_v2 }
  0xf5   :  { %v461_v35 = vmul.f32 %v1438_v0, %v422_v27  ;;  %v421_v36 = vmax.f32 %v335_v28, 0.0  ;;  %v350_v37 = vadd.f32 %v1086_v33, %v1421_v53  ;;  %v497_v42 = vadd.f32 %v1448_v10, %v458_v26 }
  0xf6   :  { %v344_v41 = vpop.f32.mrf.mxu0  ;;  %v514_v49 = vmul.f32 %v498_v32, %v482_v20  ;;  %v300_v20 = vadd.f32 %v1414_v51, %v1421_v53  ;;  %v487_v28 = vadd.f32 %v1448_v10, %v448_v9  ;;  %v489_v39 = vadd.f32 %v1448_v10, %v450_v19 }
  0xf7   :  { %v460_v44 = vmul.f32 %v1438_v0, %v421_v36  ;;  %v424_v45 = vmax.f32 %v350_v37, 0.0  ;;  %v345_v46 = vadd.f32 %v1421_v53, %v344_v41  ;;  %v513_v56 = vmul.f32 %v497_v42, %v481_v24 }
  0xf8   :  { %v1089_v55 = vpop.f32.mrf.mxu0  ;;  %v500_v58 = vadd.f32 %v1448_v10, %v461_v35  ;;  %v490_v35 = vadd.f32 %v1448_v10, %v451_v11  ;;  %v414_v36 = vmax.f32 %v300_v20, 0.0  ;;  %v413_v37 = vmax.f32 %v295_v21, 0.0 }
  0xf9   :  { %v499_v60 = vadd.f32 %v1448_v10, %v460_v44  ;;  %v463_v50 = vmul.f32 %v1438_v0, %v424_v45  ;;  %v423_v61 = vmax.f32 %v345_v46, 0.0  ;;  %v360_v3 = vadd.f32 %v1089_v55, %v1421_v53  ;;  %1110 = vmatprep.mubr.msk.f32.mxu1 %vm81_vm0, %v513_v56 }
  0xfa   :  { %v354_v4 = vpop.f32.mrf.mxu0  ;;  %1111 = vmatmul.mubr.msk.f32.vlgmr.msra.gmra.mxu1 %vm81_vm0, %v514_v49  ;;  %v516_v15 = vmul.f32 %v500_v58, %v484_v29  ;;  %v305_v29 = vadd.f32 %v1421_v53, %v1427_v57  ;;  %v310_v57 = vadd.f32 %v1423_v54, %v1421_v53  ;;  %v315_v44 = vadd.f32 %v1421_v53, %v1433_v63 }
  0xfb   :  { %v515_v6 = vmul.f32 %v499_v60, %v483_v34  ;;  %v462_v7 = vmul.f32 %v1438_v0, %v423_v61  ;;  %v355_v8 = vadd.f32 %v1421_v53, %v354_v4  ;;  %v502_v12 = vadd.f32 %v1448_v10, %v463_v50 }
  0xfc   :  { %v426_v13 = vmax.f32 %v360_v3, 0.0  ;;  %v1092_v14 = vpop.f32.mrf.mxu0  ;;  %v415_v43 = vmax.f32 %v305_v29, 0.0  ;;  %v453_v56 = vmul.f32 %v1438_v0, %v414_v36  ;;  %v452_v58 = vmul.f32 %v1438_v0, %v413_v37  ;;  %v750_v37 = vld [vmem:[#allocation2] sm:$0x1] }
  0xfd   :  { %v501_v16 = vadd.f32 %v1448_v10, %v462_v7  ;;  %v425_v17 = vmax.f32 %v355_v8, 0.0  ;;  %v370_v18 = vadd.f32 %v1092_v14, %v1421_v53  ;;  %1113 = vmatprep.mubr.msk.f32.mxu1 %vm81_vm0, %v515_v6  ;;  %v518_v51 = vmul.f32 %v502_v12, %v486_v62 }
  0xfe   :  { %v465_v22 = vmul.f32 %v1438_v0, %v426_v13  ;;  %v364_v23 = vpop.f32.mrf.mxu0  ;;  %1114 = vmatmul.mubr.msk.f32.gmra.mxu1 %vm81_vm0, %v516_v15  ;;  %v416_v60 = vmax.f32 %v310_v57, 0.0  ;;  %v320_v61 = vadd.f32 %v1430_v59, %v1421_v53  ;;  %v454_v3 = vmul.f32 %v1438_v0, %v415_v43 }
  0xff   :  { %v517_v24 = vmul.f32 %v501_v16, %v485_v1  ;;  %v464_v25 = vmul.f32 %v1438_v0, %v425_v17  ;;  %v428_v26 = vmax.f32 %v370_v18, 0.0  ;;  %v365_v27 = vadd.f32 %v1421_v53, %v364_v23 }
 0x100   :  { %v504_v30 = vadd.f32 %v1448_v10, %v465_v22  ;;  %v1095_v52 = vpop.f32.mrf.mxu0  ;;  %v417_v4 = vmax.f32 %v315_v44, 0.0  ;;  %v492_v12 = vadd.f32 %v1448_v10, %v453_v56  ;;  %v491_v13 = vadd.f32 %v1448_v10, %v452_v58 }
 0x101   :  { %v503_v31 = vadd.f32 %v1448_v10, %v464_v25  ;;  %v467_v32 = vmul.f32 %v1438_v0, %v428_v26  ;;  %v427_v33 = vmax.f32 %v365_v27, 0.0  ;;  %v380_v34 = vadd.f32 %v1095_v52, %v1421_v53  ;;  %1116 = vmatprep.mubr.msk.f32.mxu1 %vm81_vm0, %v517_v24 }
 0x102   :  { %v374_v38 = vpop.f32.mrf.mxu0  ;;  %1117 = vmatmul.mubr.msk.f32.gmra.mxu1 %vm81_vm0, %v518_v51  ;;  %v520_v45 = vmul.f32 %v504_v30, %v488_v5  ;;  %v455_v14 = vmul.f32 %v1438_v0, %v416_v60  ;;  %v418_v17 = vmax.f32 %v320_v61, 0.0  ;;  %v493_v21 = vadd.f32 %v1448_v10, %v454_v3 }
 0x103   :  { %v519_v40 = vmul.f32 %v503_v31, %v487_v28  ;;  %v466_v41 = vmul.f32 %v1438_v0, %v427_v33  ;;  %v430_v42 = vmax.f32 %v380_v34, 0.0  ;;  %v375_v46 = vadd.f32 %v1421_v53, %v374_v38 }
 0x104   :  { %v1098_v47 = vpop.f32.mrf.mxu0  ;;  %v506_v48 = vadd.f32 %v1448_v10, %v467_v32  ;;  %v456_v22 = vmul.f32 %v1438_v0, %v417_v4  ;;  %v494_v29 = vadd.f32 %v1448_v10, %v455_v14  ;;  %v1202_v57 = vmov 0  }
 0x105   :  { %v505_v54 = vadd.f32 %v1448_v10, %v466_v41  ;;  %v469_v49 = vmul.f32 %v1438_v0, %v430_v42  ;;  %v390_v55 = vadd.f32 %v1098_v47, %v1421_v53  ;;  %1119 = vmatprep.mubr.msk.f32.mxu1 %vm81_vm0, %v519_v40  ;;  %v429_v63 = vmax.f32 %v375_v46, 0.0  ;;  %1173 = vset.pattern.permute.xlu0 %v1202_v57 }
 0x106   :  { %v384_v50 = vpop.f32.mrf.mxu0  ;;  %1120 = vmatmul.mubr.msk.f32.gmra.mxu1 %vm81_vm0, %v520_v45  ;;  %v522_v8 = vmul.f32 %v506_v48, %v490_v35  ;;  %v495_v52 = vadd.f32 %v1448_v10, %v456_v22  ;;  %753 = vperm.xlu0 %1173, %v750_v37  }
 0x107   :  { %v521_v62 = vmul.f32 %v505_v54, %v489_v39  ;;  %v432_v1 = vmax.f32 %v390_v55, 0.0  ;;  %v385_v2 = vadd.f32 %v1421_v53, %v384_v50  ;;  %v508_v5 = vadd.f32 %v1448_v10, %v469_v49  ;;  %v938_v55 = vld [vmem:[%s1618_s7] ss:$0 sm:$0xff] }
 0x108   :  { %v468_v6 = vmul.f32 %v1438_v0, %v429_v63  ;;  %v1101_v7 = vpop.f32.mrf.mxu0 }
 0x109   :  { %v471_v9 = vmul.f32 %v1438_v0, %v432_v1  ;;  %v431_v11 = vmax.f32 %v385_v2, 0.0  ;;  %v400_v59 = vadd.f32 %v1101_v7, %v1421_v53  ;;  %1122 = vmatprep.mubr.msk.f32.mxu1 %vm81_vm0, %v521_v62  ;;  %v524_v23 = vmul.f32 %v508_v5, %v492_v12 }
 0x10a   :  { %v507_v15 = vadd.f32 %v1448_v10, %v468_v6  ;;  %v394_v16 = vpop.f32.mrf.mxu0  ;;  %1123 = vmatmul.mubr.msk.f32.gmra.mxu1 %vm81_vm0, %v522_v8 }
 0x10b   :  { %v470_v18 = vmul.f32 %v1438_v0, %v431_v11  ;;  %v434_v19 = vmax.f32 %v400_v59, 0.0  ;;  %v395_v20 = vadd.f32 %v1421_v53, %v394_v16  ;;  %v510_v25 = vadd.f32 %v1448_v10, %v471_v9 }
 0x10c   :  { %v523_v24 = vmul.f32 %v507_v15, %v491_v13  ;;  %v457_v53 = vmul.f32 %v1438_v0, %v418_v17 }
 0x10d   :  { %v509_v26 = vadd.f32 %v1448_v10, %v470_v18  ;;  %v473_v27 = vmul.f32 %v1438_v0, %v434_v19  ;;  %v433_v28 = vmax.f32 %v395_v20, 0.0  ;;  %v526_v31 = vmul.f32 %v510_v25, %v494_v29 }
 0x10e   :  { %1125 = vmatprep.mubr.msk.f32.mxu1 %vm81_vm0, %v523_v24  ;;  %v496_v34 = vadd.f32 %v1448_v10, %v457_v53  ;;  %v756_v29 = vlaneseq }
 0x10f   :  { %v525_v51 = vmul.f32 %v509_v26, %v493_v21  ;;  %v472_v30 = vmul.f32 %v1438_v0, %v433_v28  ;;  %1126 = vmatmul.mubr.msk.f32.gmra.mxu1 %vm81_vm0, %v524_v23  ;;  %v512_v32 = vadd.f32 %v1448_v10, %v473_v27  ;;  %v1200_v0 = vmov 0.0   ;;  %v749_v28 = vld [vmem:[%s1619_s8] sm:$0x1]  ;;  %s1178_s8 = scalar_lea.vmem %s896_s30, 16 }
 0x110   :  { %1134 = vmatprep.subr.mxu0 %v1200_v0  ;;  %1166 = vmatprep.mubr.msk.f32.mxu0 %vm1201_vm1, %v1200_v0  ;;  %v757_v53 = vshrl.u32 %v756_v29, 7  ;;  %p1179_p0 = scmp.ne.s32.totalorder %s896_s30, %s1178_s8  ;;  %p1184_p2 = scmp.lt.s32.totalorder %s1182_s11, %s1178_s8 }
 0x111   :  { %v511_v33 = vadd.f32 %v1448_v10, %v472_v30  ;;  %1128 = vmatprep.mubr.msk.f32.mxu1 %vm81_vm0, %v525_v51  ;;  %v528_v36 = vmul.f32 %v512_v32, %v496_v34 }
 0x112   :  { %v758_v51 = vsub.s32 0, %v757_v53  ;;  %p1185_p3 = por %p1184_p2, %p1183_p1 }
 0x113   :  { %v527_v35 = vmul.f32 %v511_v33, %v495_v52  ;;  %1129 = vmatmul.mubr.msk.f32.gmra.mxu1 %vm81_vm0, %v526_v31 }
 0x114   :  { %p1186_p4 = pnand %p1185_p3, %p1179_p0 }
 0x115   :  { %1131 = vmatprep.mubr.msk.f32.mxu1 %vm81_vm0, %v527_v35 }
 0x117   :  { %1132 = vmatmul.mubr.msk.f32.gmra.mxu1 %vm81_vm0, %v528_v36 }
 0x181   :  { %v754_v30 = vpop.permute.xlu0 %753 }
 0x182   :  { %v759_v52 = vrot.slane %v754_v30, %v758_v51 }
 0x1ba   :  { %v1561_v38 = vpop.f32.mrf.mxu1 }
 0x1bb   :  { %v660_v23 = vadd.f32 %v1561_v38, %v938_v55 }
 0x1bc   :  { %v1563_v10 = vpop.f32.mrf.mxu1 }
 0x1bd   :  { %v734_v25 = vmax.f32 %v660_v23, 0.0  ;;  %v655_v26 = vadd.f32 %v938_v55, %v1563_v10 }
 0x1be   :  { %v1115_v39 = vpop.f32.mrf.mxu1 }
 0x1bf   :  { %v670_v19 = vadd.f32 %v1115_v39, %v938_v55  ;;  %v733_v27 = vmax.f32 %v655_v26, 0.0 }
 0x1c0   :  { %v1565_v40 = vpop.f32.mrf.mxu1 }
 0x1c1   :  { %v736_v21 = vmax.f32 %v670_v19, 0.0  ;;  %v665_v22 = vadd.f32 %v938_v55, %v1565_v40 }
 0x1c2   :  { %v1118_v41 = vpop.f32.mrf.mxu1 }
 0x1c3   :  { %v680_v15 = vadd.f32 %v1118_v41, %v938_v55  ;;  %v735_v24 = vmax.f32 %v665_v22, 0.0 }
 0x1c4   :  { %v674_v42 = vpop.f32.mrf.mxu1 }
 0x1c5   :  { %v738_v17 = vmax.f32 %v680_v15, 0.0  ;;  %v675_v18 = vadd.f32 %v938_v55, %v674_v42 }
 0x1c6   :  { %v1121_v43 = vpop.f32.mrf.mxu1 }
 0x1c7   :  { %v690_v59 = vadd.f32 %v1121_v43, %v938_v55  ;;  %v737_v20 = vmax.f32 %v675_v18, 0.0 }
 0x1c8   :  { %v684_v44 = vpop.f32.mrf.mxu1 }
 0x1c9   :  { %v740_v13 = vmax.f32 %v690_v59, 0.0  ;;  %v685_v14 = vadd.f32 %v938_v55, %v684_v44 }
 0x1ca   :  { %v1124_v45 = vpop.f32.mrf.mxu1 }
 0x1cb   :  { %v700_v7 = vadd.f32 %v1124_v45, %v938_v55  ;;  %v739_v16 = vmax.f32 %v685_v14, 0.0 }
 0x1cc   :  { %v694_v46 = vpop.f32.mrf.mxu1 }
 0x1cd   :  { %v742_v9 = vmax.f32 %v700_v7, 0.0  ;;  %v695_v11 = vadd.f32 %v938_v55, %v694_v46 }
 0x1cf   :  { %v1127_v47 = vpop.f32.mrf.mxu1  ;;  %v741_v12 = vmax.f32 %v695_v11, 0.0 }
 0x1d0   :  { %v710_v3 = vadd.f32 %v1127_v47, %v938_v55 }
 0x1d1   :  { %v704_v48 = vpop.f32.mrf.mxu1 }
 0x1d2   :  { %v744_v5 = vmax.f32 %v710_v3, 0.0  ;;  %v705_v6 = vadd.f32 %v938_v55, %v704_v48 }
 0x1d3   :  { %v1130_v54 = vpop.f32.mrf.mxu1 }
 0x1d4   :  { %v720_v61 = vadd.f32 %v1130_v54, %v938_v55  ;;  %v743_v8 = vmax.f32 %v705_v6, 0.0 }
 0x1d5   :  { %v714_v49 = vpop.f32.mrf.mxu1 }
 0x1d6   :  { %v746_v1 = vmax.f32 %v720_v61, 0.0  ;;  %v715_v2 = vadd.f32 %v938_v55, %v714_v49 }
 0x1d7   :  { %v1133_v56 = vpop.f32.mrf.mxu1 }
 0x1d8   :  { %v730_v58 = vadd.f32 %v1133_v56, %v938_v55  ;;  %v745_v4 = vmax.f32 %v715_v2, 0.0 }
 0x1d9   :  { %v724_v60 = vpop.f32.mrf.mxu1 }
 0x1da   :  { %v748_v63 = vmax.f32 %v730_v58, 0.0  ;;  %v725_v50 = vadd.f32 %v938_v55, %v724_v60 }
 0x1dc   :  { %1135 = vmatpush3.xpose.msk.msra.mxu0 %vm760_vm2, %v748_v63  ;;  %v747_v62 = vmax.f32 %v725_v50, 0.0 }
 0x1dd   :  { %1136 = vmatprep.subr.mxu0 %v1200_v0 }
 0x1e0   :  { %1137 = vmatpush3.xpose.msk.msra.mxu0 %vm760_vm2, %v747_v62 }
 0x1e1   :  { %1138 = vmatprep.subr.mxu0 %v1200_v0 }
 0x1e4   :  { %1139 = vmatpush3.xpose.msk.msra.mxu0 %vm760_vm2, %v746_v1 }
 0x1e5   :  { %1140 = vmatprep.subr.mxu0 %v1200_v0 }
 0x1e8   :  { %1141 = vmatpush3.xpose.msk.msra.mxu0 %vm760_vm2, %v745_v4 }
 0x1e9   :  { %1142 = vmatprep.subr.mxu0 %v1200_v0 }
 0x1ec   :  { %1143 = vmatpush3.xpose.msk.msra.mxu0 %vm760_vm2, %v744_v5 }
 0x1ed   :  { %1144 = vmatprep.subr.mxu0 %v1200_v0 }
 0x1f0   :  { %1145 = vmatpush3.xpose.msk.msra.mxu0 %vm760_vm2, %v743_v8 }
 0x1f1   :  { %1146 = vmatprep.subr.mxu0 %v1200_v0 }
 0x1f4   :  { %1147 = vmatpush3.xpose.msk.msra.mxu0 %vm760_vm2, %v742_v9 }
 0x1f5   :  { %1148 = vmatprep.subr.mxu0 %v1200_v0 }
 0x1f8   :  { %1149 = vmatpush3.xpose.msk.msra.mxu0 %vm760_vm2, %v741_v12 }
 0x1f9   :  { %1150 = vmatprep.subr.mxu0 %v1200_v0 }
 0x1fc   :  { %1151 = vmatpush3.xpose.msk.msra.mxu0 %vm760_vm2, %v740_v13 }
 0x1fd   :  { %1152 = vmatprep.subr.mxu0 %v1200_v0 }
 0x200   :  { %1153 = vmatpush3.xpose.msk.msra.mxu0 %vm760_vm2, %v739_v16 }
 0x201   :  { %1154 = vmatprep.subr.mxu0 %v1200_v0 }
 0x204   :  { %1155 = vmatpush3.xpose.msk.msra.mxu0 %vm760_vm2, %v738_v17 }
 0x205   :  { %1156 = vmatprep.subr.mxu0 %v1200_v0 }
 0x208   :  { %1157 = vmatpush3.xpose.msk.msra.mxu0 %vm760_vm2, %v737_v20 }
 0x209   :  { %1158 = vmatprep.subr.mxu0 %v1200_v0 }
 0x20c   :  { %1159 = vmatpush3.xpose.msk.msra.mxu0 %vm760_vm2, %v736_v21 }
 0x20d   :  { %1160 = vmatprep.subr.mxu0 %v1200_v0 }
 0x210   :  { %1161 = vmatpush3.xpose.msk.msra.mxu0 %vm760_vm2, %v735_v24 }
 0x211   :  { %1162 = vmatprep.subr.mxu0 %v1200_v0 }
 0x214   :  { %1163 = vmatpush3.xpose.msk.msra.mxu0 %vm760_vm2, %v734_v25 }
 0x215   :  { %1164 = vmatprep.subr.mxu0 %v1200_v0 }
 0x218   :  { %1165 = vmatpush3.xpose.msk.msra.mxu0 %vm760_vm2, %v733_v27 }
 0x21b   :  { %1167 = vmatmul.mubr.msk.f32.vlgmr.msra.gmra.mxu0 %vm760_vm2, %v749_v28 }
 0x2db   :  { %v878_v31 = vpop.f32.mrf.mxu0 }
 0x2dc   :  { %v879_v32 = vadd.f32 %v878_v31, %v759_v52 }
 0x2dd   :  { %v1168_v33 = vpop.f32.mrf.mxu0 }
 0x2de   :  { %v972_v34 = vmul.f32 -1.442695, %v879_v32 }
 0x2e0   :  { %1174 = vpow2.f32 %v972_v34 }
 0x2ed   :  { %v1175_v35 = vpop.eup %1174 }
 0x2ee   :  { %v885_v36 = vadd.f32 1.0, %v1175_v35 }
 0x2f0   :  { %1176 = vrcp.f32 %v885_v36 }
 0x2fd   :  { %v1177_v0 = vpop.eup %1176 }
 0x2fe   :  { %888 = vst [vmem:[#allocation3] sm:$0x1] %v1177_v0 }
 0x2ff   :  { %1189 = shalt.err (!%p1186_p4)
}
 0x300   :  { %898 = dma.vmem_to_hbm [thread:$0]  %s896_s30, 16, %s1621_s10, [#allocation4]  }
 0x301   :  { %1198 = dma.done.wait [#allocation4], 16  }
 0x302   :  { %1199 = vsyncadd [#allocation4], 4294967280 }
 0x303   :  { %902 = vsyncpa [#allocation4], 1 }

</bundles_post_ra>
